<compile_context>
chip_gen: v6e
topology: v6e:2x2x1
jax: 0.10.0
libtpu: 0.0.40
codegen_flags: <defaults>
</compile_context>

<pallas_src>
import jax
import jax.numpy as jnp
from jax.experimental import pallas as pl
from jax.experimental.pallas import tpu as pltpu

PADDING_IDX = 1
_NEG_LARGE = -1.0e30                       # finite stand-in for -inf inside the online LSE
_VMEM_LIMIT_BYTES = 48 * 1024 * 1024       # safe on v5e/v6e (128 MiB) and v7x (64 MiB/TC)


def _round_up(x, m):
    return (x + m - 1) // m * m


def _word_predictor_kernel(x_ref, w1_ref, b1_ref, w2_ref, mask_ref,
                           out_ref,
                           h_scr, m_scr, l_scr, lse_scr):
    """Grid: (row tile i, sweep s, vocab tile j).

    s == 0: accumulate online logsumexp over vocab tiles (no output store).
    s == 1: recompute h @ W2_tile and write log-probs = logits + mask - lse.
    """
    s = pl.program_id(1)
    j = pl.program_id(2)
    nj = pl.num_programs(2)

    @pl.when(jnp.logical_and(s == 0, j == 0))
    def _():
        # hidden = tanh(x @ W1 + b1): once per row tile, reused for every vocab tile
        # of both sweeps via VMEM scratch. bf16 MXU inputs, f32 accumulation.
        h = jnp.dot(x_ref[...], w1_ref[...], preferred_element_type=jnp.float32)
        h = jnp.tanh(h + b1_ref[...])
        h_scr[...] = h.astype(h_scr.dtype)
        m_scr[...] = jnp.full(m_scr.shape, _NEG_LARGE, dtype=m_scr.dtype)
        l_scr[...] = jnp.zeros(l_scr.shape, dtype=l_scr.dtype)

    # logits tile = h @ W2_tile + additive mask (0 / -inf), f32 accumulation.
    logits = jnp.dot(h_scr[...], w2_ref[...], preferred_element_type=jnp.float32)
    logits = logits + mask_ref[...]

    @pl.when(s == 0)
    def _():
        # Online logsumexp over the vocab axis. Clamp at a large finite negative so a
        # fully masked tile can never yield exp(-inf - -inf) = NaN; clamped columns
        # still contribute exp(<= -1e30 - max) == 0 to the sum.
        z = jnp.maximum(logits, _NEG_LARGE)
        m_prev = m_scr[...]
        m_new = jnp.maximum(m_prev, jnp.max(z, axis=-1, keepdims=True))
        l_scr[...] = (l_scr[...] * jnp.exp(m_prev - m_new)
                      + jnp.sum(jnp.exp(z - m_new), axis=-1, keepdims=True))
        m_scr[...] = m_new

        @pl.when(j == nj - 1)
        def _():
            lse_scr[...] = m_scr[...] + jnp.log(l_scr[...])

    @pl.when(s == 1)
    def _():
        # log_softmax = logits - logsumexp; -inf masked columns stay exactly -inf.
        out_ref[...] = (logits - lse_scr[...]).astype(out_ref.dtype)


def word_predictor_forward(hiddens, w_lin, b_lin, w_proj, *,
                           padding_idx=PADDING_IDX, tm=512, tv=2048,
                           compute_dtype=jnp.bfloat16, out_dtype=jnp.float32):
    """hiddens: [..., input_size]; returns log-probs [..., n_words] (float32 default)."""
    *lead, input_size = hiddens.shape
    d_word, in_sz = w_lin.shape            # PyTorch layout: (out, in)
    assert in_sz == input_size
    n_words = w_proj.shape[0]              # (n_words, d_word_vec)

    x2d = hiddens.reshape(-1, input_size)
    M = x2d.shape[0]

    # Tile clamping:
    #  * keep the (8, 128) layout contract,
    #  * guarantee >= 2 row tiles so the "parallel" row axis shards across both
    #    TensorCores on v7x even for small batch*seq,
    #  * keep tiles inside the conservative 48 MiB VMEM budget (true at defaults).
    tm = max(8, min(tm, _round_up(max(pl.cdiv(M, 2), 1), 8)))
    tv = max(128, min(tv, _round_up(n_words, 128)))
    M_pad = _round_up(M, tm)
    V_pad = _round_up(n_words, tv)

    # Pad rows with zeros; pad vocab with zero weight columns (masked to -inf below).
    x2d = jnp.pad(x2d, ((0, M_pad - M), (0, 0))).astype(compute_dtype)
    w1 = w_lin.T.astype(compute_dtype)                                   # (in, d_word)
    b1 = b_lin.reshape(1, d_word).astype(jnp.float32)                    # (1, d_word)
    w2 = jnp.pad(w_proj.T, ((0, 0), (0, V_pad - n_words))).astype(compute_dtype)

    # Precomputed additive mask: -inf at padding_idx and at padded vocab columns.
    col = jnp.arange(V_pad)
    masked = col >= n_words
    if padding_idx >= 0:
        masked = masked | (col == padding_idx)
    mask_bias = jnp.where(masked, -jnp.inf, 0.0).astype(jnp.float32).reshape(1, V_pad)

    n_row_tiles = M_pad // tm
    n_voc_tiles = V_pad // tv
    grid = (n_row_tiles, 2, n_voc_tiles)   # (row tiles, {lse sweep, write sweep}, vocab tiles)

    itemsize = jnp.dtype(compute_dtype).itemsize
    cost = pl.CostEstimate(
        # h matmul once per row tile + h@W2 in both sweeps.
        flops=2 * M_pad * input_size * d_word + 2 * (2 * M_pad * d_word * V_pad),
        transcendentals=M_pad * d_word + M_pad * V_pad + M_pad,     # tanh + exp + log
        bytes_accessed=(M_pad * input_size * itemsize                # x
                        + input_size * d_word * itemsize             # W1
                        + 2 * n_row_tiles * d_word * V_pad * itemsize  # W2, 2 sweeps/row tile
                        + M_pad * V_pad * jnp.dtype(out_dtype).itemsize),  # output write
    )

    out = pl.pallas_call(
        _word_predictor_kernel,
        out_shape=jax.ShapeDtypeStruct((M_pad, V_pad), out_dtype),
        grid_spec=pltpu.PrefetchScalarGridSpec(
            num_scalar_prefetch=0,
            grid=grid,
            in_specs=[
                pl.BlockSpec((tm, input_size), lambda i, s, j: (i, 0)),      # x rows
                pl.BlockSpec((input_size, d_word), lambda i, s, j: (0, 0)),  # W1 (resident)
                pl.BlockSpec((1, d_word), lambda i, s, j: (0, 0)),           # b1 (resident)
                pl.BlockSpec((d_word, tv), lambda i, s, j: (0, j)),          # W2 vocab tile
                pl.BlockSpec((1, tv), lambda i, s, j: (0, j)),               # -inf mask tile
            ],
            # During the LSE sweep (s==0) the output block index stays pinned at (i, 0),
            # so no garbage blocks are ever written back; real blocks stream out in s==1.
            out_specs=pl.BlockSpec((tm, tv), lambda i, s, j: (i, j * s)),
            scratch_shapes=[
                pltpu.VMEM((tm, d_word), compute_dtype),   # h, reused across sweeps/tiles
                pltpu.VMEM((tm, 1), jnp.float32),          # running max
                pltpu.VMEM((tm, 1), jnp.float32),          # running sum
                pltpu.VMEM((tm, 1), jnp.float32),          # logsumexp
            ],
        ),
        compiler_params=pltpu.CompilerParams(
            dimension_semantics=("parallel", "arbitrary", "arbitrary"),
            vmem_limit_bytes=_VMEM_LIMIT_BYTES),
        cost_estimate=cost,
    )(x2d, w1, b1, w2, mask_bias)

    return out[:M, :n_words].reshape(*lead, n_words)


def _reference(hiddens, w_lin, b_lin, w_proj, *, compute_dtype=jnp.bfloat16):
    # Mirrors the kernel's bf16-matmul / f32-accumulate numerics.
    x = hiddens.reshape(-1, hiddens.shape[-1]).astype(compute_dtype)
    w1 = w_lin.T.astype(compute_dtype)
    w2 = w_proj.T.astype(compute_dtype)
    h = jnp.tanh(jnp.dot(x, w1, preferred_element_type=jnp.float32)
                 + b_lin.astype(jnp.float32)[None, :])
    h = h.astype(compute_dtype)
    logits = jnp.dot(h, w2, preferred_element_type=jnp.float32)
    logits = logits.at[:, PADDING_IDX].set(-jnp.inf)
    out = jax.nn.log_softmax(logits, axis=-1)
    return out.reshape(*hiddens.shape[:-1], -1)


if __name__ == "__main__":
    # Small shapes consistent with the module's forward. n_tgt_vocab is not a multiple
    # of 128 to exercise the ragged-V masking path; M=16 exercises the small-tm clamp.
    batch, seq = 2, 8
    input_size = 32          # WordPredictor input_size
    d_word_vec = 32          # config['d_word_vec']
    n_tgt_vocab = 2000       # config['n_tgt_vocab']

    key = jax.random.PRNGKey(0)
    k_x, k_w1, k_b1, k_w2 = jax.random.split(key, 4)

    hiddens = jax.random.normal(k_x, (batch, seq, input_size), dtype=jnp.float32)
    # PyTorch layout: (out_features, in_features).
    w_lin = jax.random.normal(k_w1, (d_word_vec, input_size), dtype=jnp.float32) * 0.1
    b_lin = jax.random.normal(k_b1, (d_word_vec,), dtype=jnp.float32) * 0.1
    w_proj = jax.random.normal(k_w2, (n_tgt_vocab, d_word_vec), dtype=jnp.float32) * 0.1

    fwd = jax.jit(word_predictor_forward)
    out = jax.block_until_ready(fwd(hiddens, w_lin, b_lin, w_proj))

    ref = _reference(hiddens, w_lin, b_lin, w_proj)

    assert out.shape == (batch, seq, n_tgt_vocab)
    assert out.dtype == jnp.float32
    # -inf at padding_idx, finite elsewhere; values match the bf16/f32 reference.
    assert bool(jnp.all(jnp.isneginf(out[..., PADDING_IDX])))
    finite_mask = jnp.ones((n_tgt_vocab,), bool).at[PADDING_IDX].set(False)
    assert bool(jnp.all(jnp.isfinite(out[..., finite_mask])))
    assert bool(jnp.allclose(out[..., finite_mask], ref[..., finite_mask],
                             atol=2e-2, rtol=2e-2))

    print("KERNEL_OK")
</pallas_src>

<mosaic_0001>
module attributes {stable_mosaic.version = 11 : i64} {
  func.func @_word_predictor_kernel(%arg0: i32, %arg1: i32, %arg2: i32, %arg3: memref<8x32xbf16, #tpu.memory_space<vmem>>, %arg4: memref<32x32xbf16, #tpu.memory_space<vmem>>, %arg5: memref<1x32xf32, #tpu.memory_space<vmem>>, %arg6: memref<32x2048xbf16, #tpu.memory_space<vmem>>, %arg7: memref<1x2048xf32, #tpu.memory_space<vmem>>, %arg8: memref<8x2048xf32, #tpu.memory_space<vmem>>, %arg9: memref<8x32xbf16, #tpu.memory_space<vmem>>, %arg10: memref<8x1xf32, #tpu.memory_space<vmem>>, %arg11: memref<8x1xf32, #tpu.memory_space<vmem>>, %arg12: memref<8x1xf32, #tpu.memory_space<vmem>>) attributes {dimension_semantics = [#tpu.dimension_semantics<parallel>, #tpu.dimension_semantics<arbitrary>, #tpu.dimension_semantics<arbitrary>], iteration_bounds = array<i64: 2, 2, 1>, scalar_prefetch = 0 : i64, scratch_operands = 4 : i64, tpu.core_type = #tpu.core_type<tc>, window_params = [{transform_indices = @transform_0, window_bounds = array<i64: 8, 32>}, {pipeline_mode = #tpu.pipeline_mode<synchronous>, transform_indices = @transform_1, window_bounds = array<i64: 32, 32>}, {pipeline_mode = #tpu.pipeline_mode<synchronous>, transform_indices = @transform_2, window_bounds = array<i64: 1, 32>}, {transform_indices = @transform_3, window_bounds = array<i64: 32, 2048>}, {transform_indices = @transform_4, window_bounds = array<i64: 1, 2048>}, {transform_indices = @transform_5, window_bounds = array<i64: 8, 2048>}]} {
    %c0_i32 = arith.constant 0 : i32
    %0 = arith.cmpi eq, %arg1, %c0_i32 : i32
    %c0_i32_0 = arith.constant 0 : i32
    %1 = arith.cmpi eq, %arg2, %c0_i32_0 : i32
    %2 = arith.andi %0, %1 : i1
    %3 = arith.extui %2 : i1 to i32
    %c0_i32_1 = arith.constant 0 : i32
    %4 = arith.cmpi ne, %3, %c0_i32_1 : i32
    scf.if %4 {
      %c0_10 = arith.constant 0 : index
      %c0_11 = arith.constant 0 : index
      %17 = vector.load %arg3[%c0_10, %c0_11] : memref<8x32xbf16, #tpu.memory_space<vmem>>, vector<8x32xbf16>
      %c0_12 = arith.constant 0 : index
      %c0_13 = arith.constant 0 : index
      %18 = vector.load %arg4[%c0_12, %c0_13] : memref<32x32xbf16, #tpu.memory_space<vmem>>, vector<32x32xbf16>
      %cst_14 = arith.constant dense<0.000000e+00> : vector<8x32xf32>
      %19 = tpu.matmul %17, %18, %cst_14 {dimension_numbers = #tpu.dot_dimension_numbers<[1], [0], [0], [1], [0, 0, 1, 1], [], []>} : vector<8x32xbf16>, vector<32x32xbf16>, vector<8x32xf32> -> vector<8x32xf32>
      %c0_15 = arith.constant 0 : index
      %c0_16 = arith.constant 0 : index
      %20 = vector.load %arg5[%c0_15, %c0_16] : memref<1x32xf32, #tpu.memory_space<vmem>>, vector<1x32xf32>
      %21 = vector.broadcast %20 : vector<1x32xf32> to vector<8x32xf32>
      %22 = arith.addf %19, %21 : vector<8x32xf32>
      %23 = math.tanh %22 : vector<8x32xf32>
      %24 = arith.truncf %23 : vector<8x32xf32> to vector<8x32xbf16>
      %c0_17 = arith.constant 0 : index
      %c0_18 = arith.constant 0 : index
      %25 = vector.load %arg9[%c0_17, %c0_18] : memref<8x32xbf16, #tpu.memory_space<vmem>>, vector<8x32xbf16>
      tpu.vector_store %arg9[%c0_17, %c0_18], %24 {strides = array<i32>} : memref<8x32xbf16, #tpu.memory_space<vmem>>, vector<8x32xbf16>,
      %cst_19 = arith.constant -1.000000e+30 : f32
      %26 = vector.broadcast %cst_19 : f32 to vector<8x1xf32>
      %c0_20 = arith.constant 0 : index
      %c0_21 = arith.constant 0 : index
      %27 = vector.load %arg10[%c0_20, %c0_21] : memref<8x1xf32, #tpu.memory_space<vmem>>, vector<8x1xf32>
      tpu.vector_store %arg10[%c0_20, %c0_21], %26 {strides = array<i32>} : memref<8x1xf32, #tpu.memory_space<vmem>>, vector<8x1xf32>,
      %cst_22 = arith.constant 0.000000e+00 : f32
      %28 = vector.broadcast %cst_22 : f32 to vector<8x1xf32>
      %c0_23 = arith.constant 0 : index
      %c0_24 = arith.constant 0 : index
      %29 = vector.load %arg11[%c0_23, %c0_24] : memref<8x1xf32, #tpu.memory_space<vmem>>, vector<8x1xf32>
      tpu.vector_store %arg11[%c0_23, %c0_24], %28 {strides = array<i32>} : memref<8x1xf32, #tpu.memory_space<vmem>>, vector<8x1xf32>,
    } else {
    }
    %c0 = arith.constant 0 : index
    %c0_2 = arith.constant 0 : index
    %5 = vector.load %arg9[%c0, %c0_2] : memref<8x32xbf16, #tpu.memory_space<vmem>>, vector<8x32xbf16>
    %c0_3 = arith.constant 0 : index
    %c0_4 = arith.constant 0 : index
    %6 = vector.load %arg6[%c0_3, %c0_4] : memref<32x2048xbf16, #tpu.memory_space<vmem>>, vector<32x2048xbf16>
    %cst = arith.constant dense<0.000000e+00> : vector<8x2048xf32>
    %7 = tpu.matmul %5, %6, %cst {dimension_numbers = #tpu.dot_dimension_numbers<[1], [0], [0], [1], [0, 0, 1, 1], [], []>} : vector<8x32xbf16>, vector<32x2048xbf16>, vector<8x2048xf32> -> vector<8x2048xf32>
    %c0_5 = arith.constant 0 : index
    %c0_6 = arith.constant 0 : index
    %8 = vector.load %arg7[%c0_5, %c0_6] : memref<1x2048xf32, #tpu.memory_space<vmem>>, vector<1x2048xf32>
    %9 = vector.broadcast %8 : vector<1x2048xf32> to vector<8x2048xf32>
    %10 = arith.addf %7, %9 : vector<8x2048xf32>
    %c0_i32_7 = arith.constant 0 : i32
    %11 = arith.cmpi eq, %arg1, %c0_i32_7 : i32
    %12 = arith.extui %11 : i1 to i32
    %c0_i32_8 = arith.constant 0 : i32
    %13 = arith.cmpi ne, %12, %c0_i32_8 : i32
    scf.if %13 {
      %cst_10 = arith.constant -1.000000e+30 : f32
      %17 = vector.broadcast %cst_10 : f32 to vector<8x2048xf32>
      %18 = arith.maximumf %10, %17 : vector<8x2048xf32>
      %c0_11 = arith.constant 0 : index
      %c0_12 = arith.constant 0 : index
      %19 = vector.load %arg10[%c0_11, %c0_12] : memref<8x1xf32, #tpu.memory_space<vmem>>, vector<8x1xf32>
      %cst_13 = arith.constant dense<0xFF800000> : vector<8xf32>
      %20 = vector.multi_reduction <maximumf>, %18, %cst_13 [1] : vector<8x2048xf32> to vector<8xf32>
      %21 = vector.shape_cast %20 : vector<8xf32> to vector<8x1xf32>
      %22 = arith.maximumf %19, %21 : vector<8x1xf32>
      %c0_14 = arith.constant 0 : index
      %c0_15 = arith.constant 0 : index
      %23 = vector.load %arg11[%c0_14, %c0_15] : memref<8x1xf32, #tpu.memory_space<vmem>>, vector<8x1xf32>
      %24 = arith.subf %19, %22 : vector<8x1xf32>
      %25 = math.exp %24 : vector<8x1xf32>
      %26 = arith.mulf %23, %25 : vector<8x1xf32>
      %27 = vector.broadcast %22 : vector<8x1xf32> to vector<8x2048xf32>
      %28 = arith.subf %18, %27 : vector<8x2048xf32>
      %29 = math.exp %28 : vector<8x2048xf32>
      %cst_16 = arith.constant dense<0.000000e+00> : vector<8xf32>
      %30 = vector.multi_reduction <add>, %29, %cst_16 [1] : vector<8x2048xf32> to vector<8xf32>
      %31 = vector.shape_cast %30 : vector<8xf32> to vector<8x1xf32>
      %32 = arith.addf %26, %31 : vector<8x1xf32>
      %c0_17 = arith.constant 0 : index
      %c0_18 = arith.constant 0 : index
      %33 = vector.load %arg11[%c0_17, %c0_18] : memref<8x1xf32, #tpu.memory_space<vmem>>, vector<8x1xf32>
      tpu.vector_store %arg11[%c0_17, %c0_18], %32 {strides = array<i32>} : memref<8x1xf32, #tpu.memory_space<vmem>>, vector<8x1xf32>,
      %c0_19 = arith.constant 0 : index
      %c0_20 = arith.constant 0 : index
      %34 = vector.load %arg10[%c0_19, %c0_20] : memref<8x1xf32, #tpu.memory_space<vmem>>, vector<8x1xf32>
      tpu.vector_store %arg10[%c0_19, %c0_20], %22 {strides = array<i32>} : memref<8x1xf32, #tpu.memory_space<vmem>>, vector<8x1xf32>,
      %c0_i32_21 = arith.constant 0 : i32
      %35 = arith.cmpi eq, %arg2, %c0_i32_21 : i32
      %36 = arith.extui %35 : i1 to i32
      %c0_i32_22 = arith.constant 0 : i32
      %37 = arith.cmpi ne, %36, %c0_i32_22 : i32
      scf.if %37 {
        %c0_23 = arith.constant 0 : index
        %c0_24 = arith.constant 0 : index
        %38 = vector.load %arg10[%c0_23, %c0_24] : memref<8x1xf32, #tpu.memory_space<vmem>>, vector<8x1xf32>
        %c0_25 = arith.constant 0 : index
        %c0_26 = arith.constant 0 : index
        %39 = vector.load %arg11[%c0_25, %c0_26] : memref<8x1xf32, #tpu.memory_space<vmem>>, vector<8x1xf32>
        %40 = math.log %39 : vector<8x1xf32>
        %41 = arith.addf %38, %40 : vector<8x1xf32>
        %c0_27 = arith.constant 0 : index
        %c0_28 = arith.constant 0 : index
        %42 = vector.load %arg12[%c0_27, %c0_28] : memref<8x1xf32, #tpu.memory_space<vmem>>, vector<8x1xf32>
        tpu.vector_store %arg12[%c0_27, %c0_28], %41 {strides = array<i32>} : memref<8x1xf32, #tpu.memory_space<vmem>>, vector<8x1xf32>,
      } else {
      }
    } else {
    }
    %c1_i32 = arith.constant 1 : i32
    %14 = arith.cmpi eq, %arg1, %c1_i32 : i32
    %15 = arith.extui %14 : i1 to i32
    %c0_i32_9 = arith.constant 0 : i32
    %16 = arith.cmpi ne, %15, %c0_i32_9 : i32
    scf.if %16 {
      %c0_10 = arith.constant 0 : index
      %c0_11 = arith.constant 0 : index
      %17 = vector.load %arg12[%c0_10, %c0_11] : memref<8x1xf32, #tpu.memory_space<vmem>>, vector<8x1xf32>
      %18 = vector.broadcast %17 : vector<8x1xf32> to vector<8x2048xf32>
      %19 = arith.subf %10, %18 : vector<8x2048xf32>
      %c0_12 = arith.constant 0 : index
      %c0_13 = arith.constant 0 : index
      %20 = vector.load %arg8[%c0_12, %c0_13] : memref<8x2048xf32, #tpu.memory_space<vmem>>, vector<8x2048xf32>
      tpu.vector_store %arg8[%c0_12, %c0_13], %19 {strides = array<i32>} : memref<8x2048xf32, #tpu.memory_space<vmem>>, vector<8x2048xf32>,
    } else {
    }
    return
  }
  func.func @transform_0(%arg0: i32, %arg1: i32, %arg2: i32) -> (i32, i32) {
    %c0_i32 = arith.constant 0 : i32
    %c0_i32_0 = arith.constant 0 : i32
    return %arg0, %c0_i32 : i32, i32
  }
  func.func @transform_1(%arg0: i32, %arg1: i32, %arg2: i32) -> (i32, i32) {
    %c0_i32 = arith.constant 0 : i32
    %c0_i32_0 = arith.constant 0 : i32
    %c0_i32_1 = arith.constant 0 : i32
    return %c0_i32, %c0_i32_0 : i32, i32
  }
  func.func @transform_2(%arg0: i32, %arg1: i32, %arg2: i32) -> (i32, i32) {
    %c0_i32 = arith.constant 0 : i32
    %c0_i32_0 = arith.constant 0 : i32
    %c0_i32_1 = arith.constant 0 : i32
    return %c0_i32, %c0_i32_0 : i32, i32
  }
  func.func @transform_3(%arg0: i32, %arg1: i32, %arg2: i32) -> (i32, i32) {
    %c0_i32 = arith.constant 0 : i32
    %c0_i32_0 = arith.constant 0 : i32
    return %c0_i32, %arg2 : i32, i32
  }
  func.func @transform_4(%arg0: i32, %arg1: i32, %arg2: i32) -> (i32, i32) {
    %c0_i32 = arith.constant 0 : i32
    %c0_i32_0 = arith.constant 0 : i32
    return %c0_i32, %arg2 : i32, i32
  }
  func.func @transform_5(%arg0: i32, %arg1: i32, %arg2: i32) -> (i32, i32) {
    %0 = arith.muli %arg2, %arg1 : i32
    %c0_i32 = arith.constant 0 : i32
    return %arg0, %0 : i32, i32
  }
}

</mosaic_0001>

<bundles_post_ra>
// kernel: word_predictor_forward.1
= control target key start
LH: loop header
LB: loop body
LE: loop exit
PB: predicated region body
PF: predicated region fallthrough
CT: control target
= control target key end

     0   :  { %s1510_s18 = smov 0   ;;  %s1512_s19 = smov 0   ;;  %s1822_s0 = inlined_call_operand.vmem [shape: bf16[16,32], index: 0, kind: input, shape index: {}]   ;;  %s1823_s1 = inlined_call_operand.vmem [shape: bf16[32,32], index: 1, kind: input, shape index: {}]   ;;  %s1824_s2 = inlined_call_operand.vmem [shape: f32[1,32], index: 2, kind: input, shape index: {}]   ;;  %s1825_s3 = inlined_call_operand.vmem [shape: bf16[32,2048], index: 3, kind: input, shape index: {}]   ;;  %s1826_s4 = inlined_call_operand.vmem [shape: f32[1,2048], index: 4, kind: input, shape index: {}]   ;;  %s1827_s5 = inlined_call_operand.vmem [shape: f32[16,2048], index: 5, kind: output, shape index: {}]  }
   0x1   :  { %s1514_s20 = smov 0   ;;  %s1516_s21 = smov 0  }
   0x2   :  { %s1518_s22 = smov 0  }
   0x3 LB: > { %s30_s23 = sadd.s32 1, %s1464_s20  ;;  %s34_s24 = sadd.s32 1, %s1468_s21  ;;  %s1472_s22 = sphi %s1518_s22, %s15_s22   ;;  %s1468_s21 = sphi %s1516_s21, %s1831_s21   ;;  %s1464_s20 = sphi %s1514_s20, %s1830_s20   ;;  %s1460_s19 = sphi %s1512_s19, %s1829_s19   ;;  %s1456_s18 = sphi %s1510_s18, %s1828_s18  }
   0x4   : > { %p32_p0 = scmp.ge.s32.totalorder %s30_s23, 2  ;;  %p1280_p1 = scmp.ge.s32.totalorder %s1472_s22, 1 }
   0x5   : > { %p230_p2 = scmp.lt.s32.totalorder %s1472_s22, 5 }
   0x6   : > { %s1833_s23 = smov (%p32_p0, %s30_s23), 0  ;;  %s1835_s24 = smov (!%p32_p0, %s34_s24), %s1468_s21 }
   0x7   : > { %p231_p3 = pnand %p1280_p1, %p230_p2  ;;  %p36_p4 = scmp.ge.s32.totalorder %s1835_s24, 2 }
   0x8   : > { %p271_p5 = scmp.lt.s32.totalorder (!%p231_p3), %s1460_s19, 1  ;;  %p299_p6 = scmp.eq.s32.totalorder (!%p231_p3), %s1456_s18, 0 }
   0x9   : > { %s1837_s24 = smov (%p36_p4, %s1835_s24), 0  ;;  %234 = sbr.rel (%p231_p3) target bundleno = 1109 (0x455), region = 40 }
   0xe   : > { %s1839_s19 = smov (!%p271_p5, %s1460_s19), 1  ;;  %304 = sbr.rel (!%p299_p6) target bundleno = 235 (0xeb), region = 44  ;;  %vm377_vm0 = vcmask (%p299_p6), 7168   ;;  %v1474_v0 = vmov (%p299_p6), 0.0   ;;  %v1475_v1 = vmov (%p299_p6), -1e+30  }
   0xf   : > { %s1281_s25 = sshll.u32 %s1839_s19, 2  ;;  %s1333_s26 = sshll.u32 %s1839_s19, 7  ;;  %1338 = vmatprep.subr.bf16.mxu0 (%p299_p6), %v1474_v0  ;;  %378 = vst.msk [vmem:[#allocation3] sm:$0xff] (%p299_p6), %vm377_vm0, %v1475_v1  ;;  %379 = vst.msk [vmem:[#allocation4] sm:$0xff] (%p299_p6), %vm377_vm0, %v1474_v0  ;;  %v1392_v2 = vld [vmem:[%s1823_s1 + $0x8] sm:$0xff] (%p299_p6)   ;;  %vm1476_vm1 = vmmov (%p299_p6), 0  }
  0x10   : > { %s274_s29 = scalar_lea.vmem %s1822_s0, %s1281_s25  ;;  %s1549_s7 = scalar_lea.vmem %s1827_s5, %s1333_s26  ;;  %1342 = vmatprep.mubr.msk.bf16.mxu0 (%p299_p6), %vm1476_vm1, %v1474_v0  ;;  %1339 = vmatpush3.bf16.msra.mxu0 (%p299_p6), %v1392_v2  ;;  %v1393_v3 = vld [vmem:[%s1823_s1] sm:$0xff] (%p299_p6)   ;;  %vm329_vm2 = vcmask (%p299_p6), 261120   ;;  %vm375_vm3 = vcmask (%p299_p6), 257024  }
  0x11   : > { %1340 = vmatprep.subr.bf16.mxu0 (%p299_p6), %v1474_v0  ;;  %v305_v4 = vld [vmem:[%s274_s29] sm:$0xf] (%p299_p6) }
  0x12   : > { %v1285_v5 = vld [vmem:[%s1824_s2] ss:$0 sm:$0xff] (%p299_p6) }
  0x14   : > { %1341 = vmatpush3.bf16.msra.mxu0 %v1393_v3 }
  0x17   : > { %1343 = vmatmul.mubr.msk.bf16.vlgmr.msra.gmra.mxu0 %vm329_vm2, %v305_v4 }
  0xd7   : > { %v367_v6 = vpop.f32.mrf.mxu0 }
  0xd8   : > { %v368_v7 = vadd.f32 %v1285_v5, %v367_v6 }
  0xd9   : > { %v1344_v8 = vpop.f32.mrf.mxu0 }
  0xda   : > { %1394 = vtanh.f32 %v368_v7 }
  0xdb   : > { %v370_v9 = vpop.f32.mrf.mxu0 }
  0xdd   : > { %v1345_v10 = vpop.f32.mrf.mxu0 }
  0xe7   : > { %v1395_v11 = vpop.eup %1394 }
  0xe8   : > { %v374_v12 = vpack.c.bf16 %v1395_v11, %v1395_v11 }
  0xea   : > { %376 = vst.msk [vmem:[#allocation2] sm:$0xf] %vm375_vm3, %v374_v12 }
  0xeb PF: > { %v397_v13 = vld [vmem:[%s1825_s3 + $0x80] sm:$0xff]  ;;  %v398_v15 = vld [vmem:[%s1825_s3 + $0x88] sm:$0xff]  ;;  %v1477_v21 = vmov 0   ;;  %v399_v28 = vld [vmem:[%s1825_s3 + $0x90] sm:$0xff]  ;;  %vm657_vm4 = vcmask 261120   ;;  %p1329_p7 = scmp.ne.s32.totalorder %s1456_s18, 0 }
  0xec   : > { %v405_v14 = vld [vmem:[%s1825_s3 + $0xc0] sm:$0xff]  ;;  %v406_v17 = vld [vmem:[%s1825_s3 + $0xc8] sm:$0xff]  ;;  %693 = vmatprep.mubr.bf16.mxu0 %v1477_v21  ;;  %734 = vmatprep.mubr.bf16.mxu1 %v1477_v21  ;;  %v407_v29 = vld [vmem:[%s1825_s3 + $0xd0] sm:$0xff] }
  0xed   : > { %v1306_v16 = vcombine.high %v397_v13, %v405_v14  ;;  %v1305_v18 = vcombine.low %v397_v13, %v405_v14  ;;  %v381_v19 = vld [vmem:[%s1825_s3] sm:$0xff]  ;;  %v1308_v22 = vcombine.high %v398_v15, %v406_v17  ;;  %v1307_v23 = vcombine.low %v398_v15, %v406_v17  ;;  %v382_v25 = vld [vmem:[%s1825_s3 + $0x8] sm:$0xff]  ;;  %v400_v30 = vld [vmem:[%s1825_s3 + $0x98] sm:$0xff] }
  0xee   : > { %v389_v20 = vld [vmem:[%s1825_s3 + $0x40] sm:$0xff]  ;;  %v390_v26 = vld [vmem:[%s1825_s3 + $0x48] sm:$0xff]  ;;  %v408_v32 = vld [vmem:[%s1825_s3 + $0xd8] sm:$0xff]  ;;  %v1310_v34 = vcombine.high %v399_v28, %v407_v29  ;;  %v1309_v41 = vcombine.low %v399_v28, %v407_v29  ;;  %v417_v15 = vlaneseq }
  0xef   : > { %v1290_v24 = vcombine.high %v381_v19, %v389_v20  ;;  %673 = vmatprep.subr.bf16.mxu0 %v1306_v16  ;;  %v1292_v27 = vcombine.high %v382_v25, %v390_v26  ;;  %714 = vmatprep.subr.bf16.mxu1 %v1308_v22  ;;  %v1289_v31 = vcombine.low %v381_v19, %v389_v20  ;;  %v383_v36 = vld [vmem:[%s1825_s3 + $0x10] sm:$0xff]  ;;  %v384_v38 = vld [vmem:[%s1825_s3 + $0x18] sm:$0xff]  ;;  %v401_v45 = vld [vmem:[%s1825_s3 + $0xa0] sm:$0xff] }
  0xf0   : > { %674 = vmatpush1.bf16.msra.mxu0 %v1305_v18  ;;  %715 = vmatpush1.bf16.msra.mxu1 %v1307_v23  ;;  %v1291_v33 = vcombine.low %v382_v25, %v390_v26  ;;  %v1312_v35 = vcombine.high %v400_v30, %v408_v32  ;;  %v391_v37 = vld [vmem:[%s1825_s3 + $0x50] sm:$0xff]  ;;  %v392_v39 = vld [vmem:[%s1825_s3 + $0x58] sm:$0xff]  ;;  %v1311_v42 = vcombine.low %v400_v30, %v408_v32  ;;  %v409_v46 = vld [vmem:[%s1825_s3 + $0xe0] sm:$0xff]  ;;  %v1682_v16 = vshrl.u32 %v417_v15, 7 }
  0xf1   : > { %675 = vmatprep.subr.bf16.mxu0 %v1290_v24  ;;  %716 = vmatprep.subr.bf16.mxu1 %v1292_v27  ;;  %v1610_v40 = vld [vmem:[#allocation2] sm:$0xf]  ;;  %v1294_v43 = vcombine.high %v383_v36, %v391_v37  ;;  %v1296_v44 = vcombine.high %v384_v38, %v392_v39  ;;  %v402_v47 = vld [vmem:[%s1825_s3 + $0xa8] sm:$0xff]  ;;  %v1293_v49 = vcombine.low %v383_v36, %v391_v37  ;;  %v403_v61 = vld [vmem:[%s1825_s3 + $0xb0] sm:$0xff] }
  0xf2   : > { %v410_v48 = vld [vmem:[%s1825_s3 + $0xe8] sm:$0xff]  ;;  %v1295_v50 = vcombine.low %v384_v38, %v392_v39  ;;  %v1314_v51 = vcombine.high %v401_v45, %v409_v46  ;;  %v385_v53 = vld [vmem:[%s1825_s3 + $0x20] sm:$0xff]  ;;  %v1313_v57 = vcombine.low %v401_v45, %v409_v46  ;;  %v411_v62 = vld [vmem:[%s1825_s3 + $0xf0] sm:$0xff]  ;;  %v419_v17 = vsub.s32 0, %v1682_v16 }
  0xf3   : > { %v1316_v52 = vcombine.high %v402_v47, %v410_v48  ;;  %v393_v54 = vld [vmem:[%s1825_s3 + $0x60] sm:$0xff]  ;;  %v386_v55 = vld [vmem:[%s1825_s3 + $0x28] sm:$0xff]  ;;  %v1315_v58 = vcombine.low %v402_v47, %v410_v48  ;;  %v404_v63 = vld [vmem:[%s1825_s3 + $0xb8] sm:$0xff]  ;;  %v1318_v3 = vcombine.high %v403_v61, %v411_v62  ;;  %v1317_v9 = vcombine.low %v403_v61, %v411_v62 }
  0xf4   : > { %676 = vmatpush1.bf16.msra.mxu0 %v1289_v31  ;;  %717 = vmatpush1.bf16.msra.mxu1 %v1291_v33  ;;  %v394_v56 = vld [vmem:[%s1825_s3 + $0x68] sm:$0xff]  ;;  %v1298_v59 = vcombine.high %v385_v53, %v393_v54  ;;  %v412_v0 = vld [vmem:[%s1825_s3 + $0xf8] sm:$0xff]  ;;  %v1297_v1 = vcombine.low %v385_v53, %v393_v54  ;;  %v387_v5 = vld [vmem:[%s1825_s3 + $0x30] sm:$0xff]  ;;  %v427_v19 = vsub.s32 2, %v1682_v16  ;;  %v423_v20 = vsub.s32 1, %v1682_v16 }
  0xf5   : > { %755 = vmatprep.subr.bf16.mxu0 %v1310_v34  ;;  %796 = vmatprep.subr.bf16.mxu1 %v1312_v35  ;;  %v1300_v60 = vcombine.high %v386_v55, %v394_v56  ;;  %v1299_v2 = vcombine.low %v386_v55, %v394_v56  ;;  %v1320_v4 = vcombine.high %v404_v63, %v412_v0  ;;  %v395_v6 = vld [vmem:[%s1825_s3 + $0x70] sm:$0xff]  ;;  %v388_v7 = vld [vmem:[%s1825_s3 + $0x38] sm:$0xff]  ;;  %v413_v18 = vld [vmem:[%s1826_s4] sm:$0xff]  ;;  %v435_v29 = vsub.s32 4, %v1682_v16 }
  0xf6   : > { %v396_v8 = vld [vmem:[%s1825_s3 + $0x78] sm:$0xff]  ;;  %v1319_v10 = vcombine.low %v404_v63, %v412_v0  ;;  %v1302_v11 = vcombine.high %v387_v5, %v395_v6  ;;  %v1301_v13 = vcombine.low %v387_v5, %v395_v6  ;;  %v420_v22 = vrot.slane %v413_v18, %v419_v17 }
  0xf7   : > { %1321 = vmatmul.mubr.msk.bf16.vlgmr.msra.gmra.mxu0 %vm657_vm4, %v1610_v40  ;;  %1322 = vmatmul.mubr.msk.bf16.vlgmr.msra.gmra.mxu1 %vm657_vm4, %v1610_v40  ;;  %v1304_v12 = vcombine.high %v388_v7, %v396_v8  ;;  %v1303_v14 = vcombine.low %v388_v7, %v396_v8  ;;  %v428_v23 = vrot.slane %v413_v18, %v427_v19  ;;  %v443_v32 = vsub.s32 6, %v1682_v16 }
  0xf8   : > { %756 = vmatpush1.bf16.msra.mxu0 %v1309_v41  ;;  %797 = vmatpush1.bf16.msra.mxu1 %v1311_v42  ;;  %v424_v24 = vrot.slane %v413_v18, %v423_v20  ;;  %v439_v35 = vsub.s32 5, %v1682_v16  ;;  %v447_v38 = vsub.s32 7, %v1682_v16 }
  0xf9   : > { %757 = vmatprep.subr.bf16.mxu0 %v1294_v43  ;;  %798 = vmatprep.subr.bf16.mxu1 %v1296_v44  ;;  %v444_v42 = vrot.slane %v413_v18, %v443_v32 }
  0xfa   : > { %775 = vmatprep.mubr.bf16.mxu0 %v1477_v21  ;;  %816 = vmatprep.mubr.bf16.mxu1 %v1477_v21  ;;  %v440_v44 = vrot.slane %v413_v18, %v439_v35  ;;  %v448_v46 = vrot.slane %v413_v18, %v447_v38 }
  0xfc   : > { %758 = vmatpush1.bf16.msra.mxu0 %v1293_v49  ;;  %799 = vmatpush1.bf16.msra.mxu1 %v1295_v50 }
  0xfd   : > { %837 = vmatprep.subr.bf16.mxu0 %v1314_v51  ;;  %878 = vmatprep.subr.bf16.mxu1 %v1316_v52  ;;  %v414_v51 = vld [vmem:[%s1826_s4 + $0x8] sm:$0xff] }
  0xfe   : > { %v456_v61 = vrot.slane %v414_v51, %v423_v20  ;;  %v480_v15 = vrot.slane %v414_v51, %v447_v38 }
  0xff   : > { %1323 = vmatmul.mubr.msk.bf16.vlgmr.msra.gmra.mxu0 %vm657_vm4, %v1610_v40  ;;  %1324 = vmatmul.mubr.msk.bf16.vlgmr.msra.gmra.mxu1 %vm657_vm4, %v1610_v40 }
 0x100   : > { %838 = vmatpush1.bf16.msra.mxu0 %v1313_v57  ;;  %879 = vmatpush1.bf16.msra.mxu1 %v1315_v58  ;;  %v452_v57 = vrot.slane %v414_v51, %v419_v17 }
 0x101   : > { %839 = vmatprep.subr.bf16.mxu0 %v1298_v59  ;;  %880 = vmatprep.subr.bf16.mxu1 %v1300_v60  ;;  %v460_v59 = vrot.slane %v414_v51, %v427_v19 }
 0x102   : > { %857 = vmatprep.mubr.bf16.mxu0 %v1477_v21  ;;  %898 = vmatprep.mubr.bf16.mxu1 %v1477_v21 }
 0x104   : > { %840 = vmatpush1.bf16.msra.mxu0 %v1297_v1  ;;  %881 = vmatpush1.bf16.msra.mxu1 %v1299_v2 }
 0x105   : > { %919 = vmatprep.subr.bf16.mxu0 %v1318_v3  ;;  %960 = vmatprep.subr.bf16.mxu1 %v1320_v4 }
 0x107   : > { %1325 = vmatmul.mubr.msk.bf16.vlgmr.msra.gmra.mxu0 %vm657_vm4, %v1610_v40  ;;  %1326 = vmatmul.mubr.msk.bf16.vlgmr.msra.gmra.mxu1 %vm657_vm4, %v1610_v40 }
 0x108   : > { %920 = vmatpush1.bf16.msra.mxu0 %v1317_v9  ;;  %961 = vmatpush1.bf16.msra.mxu1 %v1319_v10  ;;  %v468_v9 = vrot.slane %v414_v51, %v435_v29 }
 0x109   : > { %921 = vmatprep.subr.bf16.mxu0 %v1302_v11  ;;  %962 = vmatprep.subr.bf16.mxu1 %v1304_v12  ;;  %v476_v11 = vrot.slane %v414_v51, %v443_v32 }
 0x10a   : > { %939 = vmatprep.mubr.bf16.mxu0 %v1477_v21  ;;  %980 = vmatprep.mubr.bf16.mxu1 %v1477_v21  ;;  %v431_v21 = vsub.s32 3, %v1682_v16 }
 0x10c   : > { %922 = vmatpush1.bf16.msra.mxu0 %v1301_v13  ;;  %963 = vmatpush1.bf16.msra.mxu1 %v1303_v14  ;;  %v432_v26 = vrot.slane %v413_v18, %v431_v21  ;;  %v464_v63 = vrot.slane %v414_v51, %v431_v21  ;;  %v472_v13 = vrot.slane %v414_v51, %v439_v35 }
 0x10f   : > { %1327 = vmatmul.mubr.msk.bf16.vlgmr.msra.gmra.mxu0 %vm657_vm4, %v1610_v40  ;;  %1328 = vmatmul.mubr.msk.bf16.vlgmr.msra.gmra.mxu1 %vm657_vm4, %v1610_v40  ;;  %v436_v40 = vrot.slane %v413_v18, %v435_v29 }
 0x1b7   : > { %v695_v25 = vpop.f32.mrf.mxu0  ;;  %v736_v28 = vpop.f32.mrf.mxu1 }
 0x1b8   : > { %v1691_v27 = vadd.f32 %v695_v25, %v420_v22  ;;  %v1694_v30 = vadd.f32 %v736_v28, %v428_v23 }
 0x1b9   : > { %v697_v31 = vpop.f32.mrf.mxu0  ;;  %v738_v34 = vpop.f32.mrf.mxu1 }
 0x1ba   : > { %v1697_v33 = vadd.f32 %v697_v31, %v424_v24  ;;  %v1700_v36 = vadd.f32 %v738_v34, %v432_v26 }
 0x1bb   : > { %v699_v37 = vpop.f32.mrf.mxu0  ;;  %v740_v39 = vpop.f32.mrf.mxu1 }
 0x1bd   : > { %v700_v41 = vpop.f32.mrf.mxu0  ;;  %v741_v43 = vpop.f32.mrf.mxu1 }
 0x1bf   : > { %v777_v45 = vpop.f32.mrf.mxu0  ;;  %v818_v48 = vpop.f32.mrf.mxu1 }
 0x1c0   : > { %v1703_v47 = vadd.f32 %v777_v45, %v436_v40  ;;  %v1705_v49 = vadd.f32 %v818_v48, %v444_v42 }
 0x1c1   : > { %v779_v50 = vpop.f32.mrf.mxu0  ;;  %v820_v53 = vpop.f32.mrf.mxu1 }
 0x1c2   : > { %v1710_v52 = vadd.f32 %v779_v50, %v440_v44  ;;  %v1712_v54 = vadd.f32 %v820_v53, %v448_v46 }
 0x1c3   : > { %v781_v55 = vpop.f32.mrf.mxu0  ;;  %v822_v56 = vpop.f32.mrf.mxu1 }
 0x1c5   : > { %v782_v58 = vpop.f32.mrf.mxu0  ;;  %v823_v60 = vpop.f32.mrf.mxu1 }
 0x1c7   : > { %v859_v62 = vpop.f32.mrf.mxu0  ;;  %v900_v1 = vpop.f32.mrf.mxu1 }
 0x1c8   : > { %v1714_v0 = vadd.f32 %v859_v62, %v452_v57  ;;  %v1716_v2 = vadd.f32 %v900_v1, %v460_v59 }
 0x1c9   : > { %v861_v3 = vpop.f32.mrf.mxu0  ;;  %v902_v5 = vpop.f32.mrf.mxu1 }
 0x1ca   : > { %v1718_v4 = vadd.f32 %v861_v3, %v456_v61  ;;  %v1720_v6 = vadd.f32 %v902_v5, %v464_v63 }
 0x1cb   : > { %v863_v7 = vpop.f32.mrf.mxu0  ;;  %v904_v8 = vpop.f32.mrf.mxu1 }
 0x1cd   : > { %v864_v10 = vpop.f32.mrf.mxu0  ;;  %v905_v12 = vpop.f32.mrf.mxu1 }
 0x1cf   : > { %v941_v14 = vpop.f32.mrf.mxu0  ;;  %v982_v17 = vpop.f32.mrf.mxu1 }
 0x1d0   : > { %v1722_v16 = vadd.f32 %v941_v14, %v468_v9  ;;  %v1724_v18 = vadd.f32 %v982_v17, %v476_v11 }
 0x1d1   : > { %v943_v19 = vpop.f32.mrf.mxu0  ;;  %v984_v21 = vpop.f32.mrf.mxu1  ;;  %991 = sbr.rel (%p1329_p7) target bundleno = 965 (0x3c5), region = 48 }
 0x1d2   : > { %v1726_v20 = vadd.f32 %v943_v19, %v472_v13  ;;  %v1728_v22 = vadd.f32 %v984_v21, %v480_v15 }
 0x1d3   : > { %v945_v23 = vpop.f32.mrf.mxu0  ;;  %v986_v24 = vpop.f32.mrf.mxu1 }
 0x1d5   : > { %v946_v25 = vpop.f32.mrf.mxu0  ;;  %v987_v26 = vpop.f32.mrf.mxu1 }
 0x1d6   : > { %v992_v28 = vmax.f32 %v1691_v27, -1e+30  ;;  %v993_v29 = vmax.f32 %v1697_v33, -1e+30  ;;  %v994_v31 = vmax.f32 %v1694_v30, -1e+30 }
 0x1d7   : > { %v995_v32 = vmax.f32 %v1700_v36, -1e+30  ;;  %v996_v34 = vmax.f32 %v1703_v47, -1e+30  ;;  %v997_v35 = vmax.f32 %v1710_v52, -1e+30 }
 0x1d8   : > { %v998_v37 = vmax.f32 %v1705_v49, -1e+30  ;;  %v999_v38 = vmax.f32 %v1712_v54, -1e+30  ;;  %v1000_v39 = vmax.f32 %v1714_v0, -1e+30 }
 0x1d9   : > { %v1001_v40 = vmax.f32 %v1718_v4, -1e+30  ;;  %v1002_v41 = vmax.f32 %v1716_v2, -1e+30  ;;  %v1003_v42 = vmax.f32 %v1720_v6, -1e+30  ;;  %v1009_v43 = vmax.f32 %v992_v28, %v996_v34 }
 0x1da   : > { %v1004_v44 = vmax.f32 %v1722_v16, -1e+30  ;;  %v1005_v45 = vmax.f32 %v1726_v20, -1e+30  ;;  %v1006_v46 = vmax.f32 %v1724_v18, -1e+30  ;;  %v1010_v48 = vmax.f32 %v993_v29, %v997_v35 }
 0x1db   : > { %v1007_v50 = vmax.f32 %v1728_v22, -1e+30  ;;  %v1011_v51 = vmax.f32 %v994_v31, %v998_v37  ;;  %v1012_v53 = vmax.f32 %v995_v32, %v999_v38  ;;  %v1013_v55 = vmax.f32 %v1009_v43, %v1000_v39  ;;  %v1753_v7 = vld [vmem:[#allocation3] sm:$0xff] }
 0x1dc   : > { %v1014_v56 = vmax.f32 %v1010_v48, %v1001_v40  ;;  %v1478_v5 = vmov 0   ;;  %vm1103_vm5 = vcmask 7168  }
 0x1dd   : > { %v1015_v57 = vmax.f32 %v1011_v51, %v1002_v41  ;;  %v1016_v58 = vmax.f32 %v1012_v53, %v1003_v42  ;;  %v1017_v59 = vmax.f32 %v1013_v55, %v1004_v44  ;;  %1396 = vset.pattern.permute.xlu0 %v1478_v5 }
 0x1de   : > { %v1018_v60 = vmax.f32 %v1014_v56, %v1005_v45 }
 0x1df   : > { %v1019_v61 = vmax.f32 %v1015_v57, %v1006_v46  ;;  %v1020_v62 = vmax.f32 %v1016_v58, %v1007_v50 }
 0x1e0   : > { %v1021_v63 = vmax.f32 %v1017_v59, %v1018_v60 }
 0x1e1   : > { %v1022_v1 = vmax.f32 %v1019_v61, %v1020_v62 }
 0x1e3   : > { %v1023_v3 = vmax.f32 %v1021_v63, %v1022_v1 }
 0x1e5   : > { %1024 = vmax.xlane.f32.xlu0 %v1023_v3 }
 0x26e   : > { %v1025_v8 = vpop.xlane.xlu0 %1024 }
 0x26f   : > { %v1756_v9 = vmax.f32 %v1753_v7, %v1025_v8 }
 0x271   : > { %v1028_v10 = vsub.f32 %v1753_v7, %v1756_v9  ;;  %1105 = vst.msk [vmem:[#allocation3] sm:$0xff] %vm1103_vm5, %v1756_v9  ;;  %1034 = vperm.xlu0 %1396, %v1756_v9  }
 0x2ec   : > { %v1035_v11 = vpop.permute.xlu0 %1034 }
 0x2ed   : > { %v1037_v12 = vsub.f32 %v992_v28, %v1035_v11  ;;  %v1038_v13 = vsub.f32 %v993_v29, %v1035_v11  ;;  %v1039_v14 = vsub.f32 %v994_v31, %v1035_v11  ;;  %v1040_v15 = vsub.f32 %v995_v32, %v1035_v11 }
 0x2ee   : > { %v1041_v21 = vsub.f32 %v996_v34, %v1035_v11  ;;  %v1042_v24 = vsub.f32 %v997_v35, %v1035_v11  ;;  %v1043_v26 = vsub.f32 %v998_v37, %v1035_v11  ;;  %v1044_v48 = vsub.f32 %v999_v38, %v1035_v11 }
 0x2ef   : > { %v1053_v17 = vmul.f32 1.442695, %v1037_v12  ;;  %v1055_v19 = vmul.f32 1.442695, %v1038_v13  ;;  %v1057_v23 = vmul.f32 1.442695, %v1039_v14  ;;  %v1045_v53 = vsub.f32 %v1000_v39, %v1035_v11 }
 0x2f0   : > { %v1059_v25 = vmul.f32 1.442695, %v1040_v15  ;;  %v1061_v43 = vmul.f32 1.442695, %v1041_v21  ;;  %v1063_v51 = vmul.f32 1.442695, %v1042_v24  ;;  %v1046_v29 = vsub.f32 %v1001_v40, %v1035_v11 }
 0x2f1   : > { %1397 = vpow2.f32 %v1053_v17  ;;  %v1065_v28 = vmul.f32 1.442695, %v1043_v26  ;;  %v1067_v31 = vmul.f32 1.442695, %v1044_v48  ;;  %v1047_v32 = vsub.f32 %v1002_v41, %v1035_v11 }
 0x2f2   : > { %1399 = vpow2.f32 %v1055_v19  ;;  %v1069_v34 = vmul.f32 1.442695, %v1045_v53  ;;  %v1048_v56 = vsub.f32 %v1003_v42, %v1035_v11  ;;  %v1071_v35 = vmul.f32 1.442695, %v1046_v29 }
 0x2f3   : > { %1401 = vpow2.f32 %v1057_v23  ;;  %v1049_v37 = vsub.f32 %v1004_v44, %v1035_v11  ;;  %v1073_v58 = vmul.f32 1.442695, %v1047_v32  ;;  %v1050_v39 = vsub.f32 %v1005_v45, %v1035_v11 }
 0x2f4   : > { %1403 = vpow2.f32 %v1059_v25  ;;  %v1075_v40 = vmul.f32 1.442695, %v1048_v56  ;;  %v1051_v41 = vsub.f32 %v1006_v46, %v1035_v11  ;;  %v1052_v44 = vsub.f32 %v1007_v50, %v1035_v11 }
 0x2f5   : > { %1405 = vpow2.f32 %v1061_v43  ;;  %v1077_v42 = vmul.f32 1.442695, %v1049_v37  ;;  %v1079_v1 = vmul.f32 1.442695, %v1050_v39  ;;  %v1029_v32 = vmul.f32 1.442695, %v1028_v10 }
 0x2f6   : > { %1407 = vpow2.f32 %v1063_v51  ;;  %v1081_v45 = vmul.f32 1.442695, %v1051_v41  ;;  %v1083_v13 = vmul.f32 1.442695, %v1052_v44 }
 0x2f7   : > { %1409 = vpow2.f32 %v1065_v28 }
 0x2f8   : > { %1411 = vpow2.f32 %v1067_v31 }
 0x2f9   : > { %1413 = vpow2.f32 %v1069_v34 }
 0x2fa   : > { %1415 = vpow2.f32 %v1071_v35 }
 0x2fb   : > { %1417 = vpow2.f32 %v1073_v58 }
 0x2fc   : > { %1419 = vpow2.f32 %v1075_v40 }
 0x2fd   : > { %1421 = vpow2.f32 %v1077_v42 }
 0x2fe   : > { %v1398_v55 = vpop.eup %1397  ;;  %1423 = vpow2.f32 %v1079_v1 }
 0x2ff   : > { %v1400_v57 = vpop.eup %1399  ;;  %1425 = vpow2.f32 %v1081_v45 }
 0x300   : > { %v1085_v38 = vadd.f32 %v1400_v57, %v1398_v55  ;;  %v1402_v59 = vpop.eup %1401  ;;  %1427 = vpow2.f32 %v1083_v13  ;;  %v1027_v55 = vld [vmem:[#allocation4] sm:$0xff] }
 0x301   : > { %v1404_v61 = vpop.eup %1403  ;;  %1429 = vpow2.f32 %v1029_v32 }
 0x302   : > { %v1086_v60 = vadd.f32 %v1402_v59, %v1085_v38  ;;  %v1406_v63 = vpop.eup %1405  ;;  %v1109_v59 = vld [vmem:[#allocation3] sm:$0xff] }
 0x303   : > { %v1408_v5 = vpop.eup %1407 }
 0x304   : > { %v1087_v62 = vadd.f32 %v1404_v61, %v1086_v60  ;;  %v1410_v12 = vpop.eup %1409 }
 0x305   : > { %v1412_v15 = vpop.eup %1411 }
 0x306   : > { %v1088_v3 = vadd.f32 %v1406_v63, %v1087_v62  ;;  %v1414_v17 = vpop.eup %1413 }
 0x307   : > { %v1416_v21 = vpop.eup %1415 }
 0x308   : > { %v1089_v8 = vadd.f32 %v1408_v5, %v1088_v3  ;;  %v1418_v50 = vpop.eup %1417 }
 0x309   : > { %v1420_v24 = vpop.eup %1419 }
 0x30a   : > { %v1090_v14 = vadd.f32 %v1410_v12, %v1089_v8  ;;  %v1422_v26 = vpop.eup %1421 }
 0x30b   : > { %v1424_v48 = vpop.eup %1423 }
 0x30c   : > { %v1091_v46 = vadd.f32 %v1412_v15, %v1090_v14  ;;  %v1426_v53 = vpop.eup %1425 }
 0x30d   : > { %v1428_v29 = vpop.eup %1427 }
 0x30e   : > { %v1092_v19 = vadd.f32 %v1414_v17, %v1091_v46  ;;  %v1430_v34 = vpop.eup %1429 }
 0x30f   : > { %v1031_v56 = vmul.f32 %v1430_v34, %v1027_v55 }
 0x310   : > { %v1093_v23 = vadd.f32 %v1416_v21, %v1092_v19 }
 0x312   : > { %v1094_v11 = vadd.f32 %v1418_v50, %v1093_v23 }
 0x314   : > { %v1095_v25 = vadd.f32 %v1420_v24, %v1094_v11 }
 0x316   : > { %v1096_v43 = vadd.f32 %v1422_v26, %v1095_v25 }
 0x318   : > { %v1097_v51 = vadd.f32 %v1424_v48, %v1096_v43 }
 0x31a   : > { %v1098_v28 = vadd.f32 %v1426_v53, %v1097_v51 }
 0x31c   : > { %v1099_v31 = vadd.f32 %v1428_v29, %v1098_v28 }
 0x31e   : > { %1100 = vadd.xlane.f32.xlu1 %v1099_v31 }
 0x3a7   : > { %v1101_v35 = vpop.xlane.xlu1 %1100 }
 0x3a8   : > { %v1102_v57 = vadd.f32 %v1101_v35, %v1031_v56 }
 0x3aa   : > { %1104 = vst.msk [vmem:[#allocation4] sm:$0xff] %vm1103_vm5, %v1102_v57 }
 0x3b1   : > { %v1110_v37 = vld [vmem:[#allocation4] sm:$0xff] }
 0x3b2   : > { %1431 = vlog2.f32 %v1110_v37 }
 0x3bf   : > { %v1432_v58 = vpop.eup %1431 }
 0x3c0   : > { %v1112_v38 = vmul.f32 0.6931472, %v1432_v58 }
 0x3c2   : > { %v1113_v39 = vadd.f32 %v1112_v38, %v1109_v59 }
 0x3c4   : > { %1114 = vst.msk [vmem:[#allocation5] sm:$0xff] %vm1103_vm5, %v1113_v39 }
 0x3c5 PF: > { %p1330_p8 = scmp.ne.s32.totalorder %s1456_s18, 1 }
 0x3c7   : > { %1118 = sbr.rel (%p1330_p8) target bundleno = 1109 (0x455), region = 56 }
 0x3cc   : > { %v1119_v7 = vld [vmem:[#allocation5] sm:$0xff]  ;;  %v1479_v9 = vmov 0  }
 0x3cd   : > { %1433 = vset.pattern.permute.xlu0 %v1479_v9 }
 0x3ce   : > { %1122 = vperm.xlu0 %1433, %v1119_v7  }
 0x449   : > { %v1123_v10 = vpop.permute.xlu0 %1122 }
 0x44a   : > { %v1125_v40 = vsub.f32 %v1691_v27, %v1123_v10  ;;  %v1126_v60 = vsub.f32 %v1697_v33, %v1123_v10  ;;  %v1127_v61 = vsub.f32 %v1694_v30, %v1123_v10  ;;  %v1128_v41 = vsub.f32 %v1700_v36, %v1123_v10 }
 0x44b   : > { %v1129_v42 = vsub.f32 %v1703_v47, %v1123_v10  ;;  %v1130_v62 = vsub.f32 %v1710_v52, %v1123_v10  ;;  %v1131_v63 = vsub.f32 %v1705_v49, %v1123_v10  ;;  %v1132_v44 = vsub.f32 %v1712_v54, %v1123_v10 }
 0x44c   : > { %v1133_v27 = vsub.f32 %v1714_v0, %v1123_v10  ;;  %v1134_v33 = vsub.f32 %v1718_v4, %v1123_v10  ;;  %v1135_v30 = vsub.f32 %v1716_v2, %v1123_v10  ;;  %v1136_v36 = vsub.f32 %v1720_v6, %v1123_v10  ;;  %1141 = vst [vmem:[%s1549_s7] sm:$0xff] %v1125_v40 }
 0x44d   : > { %1142 = vst [vmem:[%s1549_s7 + $0x8] sm:$0xff] %v1126_v60  ;;  %1143 = vst [vmem:[%s1549_s7 + $0x10] sm:$0xff] %v1127_v61  ;;  %v1137_v47 = vsub.f32 %v1722_v16, %v1123_v10  ;;  %v1138_v49 = vsub.f32 %v1726_v20, %v1123_v10  ;;  %v1139_v52 = vsub.f32 %v1724_v18, %v1123_v10 }
 0x44e   : > { %1144 = vst [vmem:[%s1549_s7 + $0x18] sm:$0xff] %v1128_v41  ;;  %v1140_v54 = vsub.f32 %v1728_v22, %v1123_v10  ;;  %1145 = vst [vmem:[%s1549_s7 + $0x20] sm:$0xff] %v1129_v42 }
 0x44f   : > { %1146 = vst [vmem:[%s1549_s7 + $0x28] sm:$0xff] %v1130_v62  ;;  %1147 = vst [vmem:[%s1549_s7 + $0x30] sm:$0xff] %v1131_v63 }
 0x450   : > { %1148 = vst [vmem:[%s1549_s7 + $0x38] sm:$0xff] %v1132_v44  ;;  %1149 = vst [vmem:[%s1549_s7 + $0x40] sm:$0xff] %v1133_v27 }
 0x451   : > { %1150 = vst [vmem:[%s1549_s7 + $0x48] sm:$0xff] %v1134_v33  ;;  %1151 = vst [vmem:[%s1549_s7 + $0x50] sm:$0xff] %v1135_v30 }
 0x452   : > { %1152 = vst [vmem:[%s1549_s7 + $0x58] sm:$0xff] %v1136_v36  ;;  %1153 = vst [vmem:[%s1549_s7 + $0x60] sm:$0xff] %v1137_v47 }
 0x453   : > { %1154 = vst [vmem:[%s1549_s7 + $0x68] sm:$0xff] %v1138_v49  ;;  %1155 = vst [vmem:[%s1549_s7 + $0x70] sm:$0xff] %v1139_v52 }
 0x454   : > { %1156 = vst [vmem:[%s1549_s7 + $0x78] sm:$0xff] %v1140_v54 }
 0x455 PF: > { %s15_s22 = sadd.s32 1, %s1472_s22   ;;  %s1828_s18 = smov %s1464_s20 }
 0x456   : > { %p12_p9 = scmp.ge.s32.totalorder %s15_s22, 6   ;;  %s1829_s19 = smov %s1468_s21 }
 0x457   : > { %s1830_s20 = smov %s1833_s23  ;;  %s1831_s21 = smov %s1837_s24 }
 0x458   :  { %14 = sbr.rel (!%p12_p9) target bundleno = 3 (0x3), region = 92 }

</bundles_post_ra>
